<compile_context>
chip_gen: v5e
topology: v5e:2x2
jax: 0.10.0
libtpu: 0.0.40
codegen_flags: <defaults>
</compile_context>

<pallas_src>
import functools

import numpy as np
import jax
import jax.numpy as jnp
from jax import lax
from jax.experimental import pallas as pl
from jax.experimental.pallas import tpu as pltpu

# Hyperparameters fixed by the PyTorch module.
EMBEDDING_SIZE = 10
NUM_FILTERS = 9
WINDOW_SIZES = (1, 2, 3, 5)
NUM_CLASSES = 3
NUM_WINDOWS = len(WINDOW_SIZES)
NWF = NUM_WINDOWS * NUM_FILTERS          # 36 fused conv output columns
PAD_MAX = max(WINDOW_SIZES) - 1          # 4 : padding of the widest conv
NUM_SHIFTS = PAD_MAX + 1                 # 5 : number of shifted matmuls


def _round_up(x, m):
    return (x + m - 1) // m * m


def _cdiv(a, b):
    return -(-a // b)


def _textcnn_kernel(b_blk, seq_blk,
                    x_ref, wf_ref, cb_ref, mask_ref, fcw_ref, fcb_ref, out_ref):
    """One grid step == one block of `b_blk` batch rows, fully fused."""
    m_rows = b_blk * seq_blk

    # Fused conv for all 4 window sizes: shift-and-accumulate matmuls (keeps data
    # lane-resident, accumulates on the MXU; no lane-axis concatenate).
    acc = jnp.dot(x_ref[0:m_rows, :], wf_ref[0],
                  preferred_element_type=jnp.float32)
    for s in range(1, NUM_SHIFTS):
        acc += jnp.dot(x_ref[s:s + m_rows, :], wf_ref[s],
                       preferred_element_type=jnp.float32)
    act = jnp.tanh(acc + cb_ref[...])                       # (m_rows, NWF), in [-1, 1]

    # (b_blk*seq_blk, NWF) -> (b_blk, seq_blk, NWF); seq_blk % 8 == 0, so this split
    # of the sublane dim is tile-aligned (no data movement).  The additive mask pushes
    # positions past each window's true conv length L+ws-1 (pad / block-crossing rows,
    # all of which read only zero rows and evaluate to tanh(bias)) below -1, so the
    # global max-pool never selects them.
    act3 = act.reshape(b_blk, seq_blk, NWF) + mask_ref[...]
    pooled = jnp.max(act3, axis=1)                          # global max-pool -> (b_blk, NWF)

    logits = jnp.dot(pooled, fcw_ref[...],
                     preferred_element_type=jnp.float32) + fcb_ref[...]   # (b_blk, 3)
    m = jnp.max(logits, axis=-1, keepdims=True)
    e = jnp.exp(logits - m)
    out_ref[...] = e / jnp.sum(e, axis=-1, keepdims=True)   # softmax over classes


def textcnn_forward(line_list, emb_table, conv_w_full, conv_biases, fc_w, fc_b):
    B, L = line_list.shape
    E = EMBEDDING_SIZE
    seq_blk = _round_up(L + 2 * PAD_MAX, 8)     # per-row padded slab, multiple of 8

    # Batch blocking: one block for small B; >= 2 "parallel" blocks (megacore) for big B,
    # capped so the per-step matmul M stays a few thousand rows.
    if B <= 8:
        b_blk = B
    else:
        m_target = 2048
        cap = max(8, (m_target // seq_blk) // 8 * 8)
        b_blk = min(cap, _round_up(_cdiv(B, 2), 8))
    n_blocks = _cdiv(B, b_blk)
    b_pad = n_blocks * b_blk

    # Glue (plain JAX): embedding gather + zero padding of the sequence axis.
    # TODO(synk): the embedding row-gather could also be moved in-kernel via
    # scalar-prefetched token ids + a VMEM-resident table; kept as an XLA gather here.
    x = emb_table[line_list].astype(jnp.float32)                    # (B, L, E)
    x = jnp.pad(x, ((0, b_pad - B), (PAD_MAX, seq_blk - L - PAD_MAX), (0, 0)))
    x_blocks = x.reshape(n_blocks, b_blk * seq_blk, E)
    # 8-row zero tail so shifted loads of (masked) tail positions never go OOB.
    x_blocks = jnp.concatenate(
        [x_blocks, jnp.zeros((n_blocks, 8, E), jnp.float32)], axis=1)

    # Fuse the 4 conv weights into one shift-indexed stack: wf[s, e, wi*F+f] = w_wi[f, kh, e]
    # with kh = s - (NUM_SHIFTS - ws); zero where the window does not use that shift.
    wf = jnp.zeros((NUM_SHIFTS, E, NWF), jnp.float32)
    cb = []
    for wi_, (w, b, ws_) in enumerate(zip(conv_w_full, conv_biases, WINDOW_SIZES)):
        off = NUM_SHIFTS - ws_
        wf = wf.at[off:off + ws_, :, wi_ * NUM_FILTERS:(wi_ + 1) * NUM_FILTERS].set(
            jnp.transpose(w, (1, 2, 0)))                            # (ws, E, F)
        cb.append(b.reshape(1, NUM_FILTERS))
    cb = jnp.concatenate(cb, axis=1)                                # (1, NWF) window-major

    # Additive validity mask: conv output for window ws only exists for t < L + ws - 1.
    mask_np = np.zeros((seq_blk, NWF), np.float32)
    for wi_, ws_ in enumerate(WINDOW_SIZES):
        mask_np[L + ws_ - 1:, wi_ * NUM_FILTERS:(wi_ + 1) * NUM_FILTERS] = -3.0
    mask = jnp.asarray(mask_np)

    # torch flattens cat(xs, dim=2) filter-major (index = f*n_w + wi); the kernel builds
    # its feature vector window-major (index = wi*F + f) -> permute fc weight rows.
    perm = np.array([f * NUM_WINDOWS + wi_
                     for wi_ in range(NUM_WINDOWS) for f in range(NUM_FILTERS)])
    fc_w_k = fc_w[perm]

    def rep(shape):  # replicated (grid-invariant) full-array block
        return pl.BlockSpec(shape, lambda i: (0,) * len(shape))

    kernel = functools.partial(_textcnn_kernel, b_blk, seq_blk)
    out = pl.pallas_call(
        kernel,
        grid=(n_blocks,),
        in_specs=[
            pl.BlockSpec((None, b_blk * seq_blk + 8, E), lambda i: (i, 0, 0)),
            rep(wf.shape), rep(cb.shape), rep(mask.shape),
            rep(fc_w_k.shape), rep(fc_b.shape),
        ],
        out_specs=pl.BlockSpec((b_blk, NUM_CLASSES), lambda i: (i, 0)),
        out_shape=jax.ShapeDtypeStruct((b_pad, NUM_CLASSES), jnp.float32),
        compiler_params=pltpu.CompilerParams(dimension_semantics=("parallel",)),
    )(x_blocks, wf, cb, mask, fc_w_k, fc_b)
    return out[:B]


def textcnn_reference(line_list, emb_table, conv_w_full, conv_biases, fc_w, fc_b):
    # Pure-JAX reference mirroring the PyTorch forward exactly (NCHW / OIHW).
    x = emb_table[line_list].astype(jnp.float32)   # (B, L, E)
    x4 = x[:, None, :, :]                          # (B, 1, L, E)
    feats = []
    for w, bias, ws in zip(conv_w_full, conv_biases, WINDOW_SIZES):
        out = lax.conv_general_dilated(
            x4, w[:, None, :, :], window_strides=(1, 1),
            padding=((ws - 1, ws - 1), (0, 0)),
            dimension_numbers=('NCHW', 'OIHW', 'NCHW'))    # (B, F, L+ws-1, 1)
        out = jnp.tanh(out + bias.reshape(1, NUM_FILTERS, 1, 1))[:, :, :, 0]
        feats.append(jnp.max(out, axis=2, keepdims=True))  # (B, F, 1)
    feat = jnp.concatenate(feats, axis=2)                  # (B, F, n_w)
    feat = feat.reshape(feat.shape[0], -1)                 # filter-major, like torch .view
    logits = feat @ fc_w + fc_b
    return jax.nn.softmax(logits, axis=1)


def _make_params(key, vocab):
    ks = jax.random.split(key, 12)
    emb = 0.1 * jax.random.normal(ks[0], (vocab, EMBEDDING_SIZE), jnp.float32)
    emb = emb.at[0].set(0.0)   # row for the 'pad' token (padding_idx semantics)
    conv_w_full, conv_biases = [], []
    for i, ws in enumerate(WINDOW_SIZES):
        w = 0.2 * jax.random.normal(ks[2 + 2 * i], (NUM_FILTERS, ws, EMBEDDING_SIZE),
                                    jnp.float32)           # torch Conv2d weight (F,1,ws,E) sans the 1
        b = 0.1 * jax.random.normal(ks[3 + 2 * i], (1, NUM_FILTERS), jnp.float32)
        conv_w_full.append(w)
        conv_biases.append(b)
    fc_w = 0.2 * jax.random.normal(ks[10], (NUM_FILTERS * NUM_WINDOWS, NUM_CLASSES),
                                   jnp.float32)  # stored as (in, out) = torch weight.T
    fc_b = 0.1 * jax.random.normal(ks[11], (1, NUM_CLASSES), jnp.float32)
    return emb, conv_w_full, conv_biases, fc_w, fc_b


if __name__ == "__main__":
    VOCAB = 16
    key = jax.random.PRNGKey(0)
    emb, conv_w_full, conv_biases, fc_w, fc_b = _make_params(key, VOCAB)

    # Small case (single grid step).
    ids = jax.random.randint(jax.random.fold_in(key, 1), (2, 8), 0, VOCAB, dtype=jnp.int32)
    probs = textcnn_forward(ids, emb, conv_w_full, conv_biases, fc_w, fc_b)
    jax.block_until_ready(probs)
    ref = textcnn_reference(ids, emb, conv_w_full, conv_biases, fc_w, fc_b)
    np.testing.assert_allclose(np.asarray(probs), np.asarray(ref), atol=2e-3, rtol=2e-3)

    # Larger case: exercises the multi-block ("parallel" grid) path and ragged tails.
    ids2 = jax.random.randint(jax.random.fold_in(key, 2), (19, 13), 0, VOCAB, dtype=jnp.int32)
    probs2 = textcnn_forward(ids2, emb, conv_w_full, conv_biases, fc_w, fc_b)
    jax.block_until_ready(probs2)
    ref2 = textcnn_reference(ids2, emb, conv_w_full, conv_biases, fc_w, fc_b)
    np.testing.assert_allclose(np.asarray(probs2), np.asarray(ref2), atol=2e-3, rtol=2e-3)

    print("KERNEL_OK")
</pallas_src>

<mosaic_0001>
module attributes {stable_mosaic.version = 11 : i64} {
  func.func @_textcnn_kernel(%arg0: i32, %arg1: memref<1x40x10xf32, #tpu.memory_space<vmem>>, %arg2: memref<5x10x36xf32, #tpu.memory_space<vmem>>, %arg3: memref<1x36xf32, #tpu.memory_space<vmem>>, %arg4: memref<16x36xf32, #tpu.memory_space<vmem>>, %arg5: memref<36x3xf32, #tpu.memory_space<vmem>>, %arg6: memref<1x3xf32, #tpu.memory_space<vmem>>, %arg7: memref<2x3xf32, #tpu.memory_space<vmem>>) attributes {dimension_semantics = [#tpu.dimension_semantics<parallel>], iteration_bounds = array<i64: 1>, scalar_prefetch = 0 : i64, scratch_operands = 0 : i64, tpu.core_type = #tpu.core_type<tc>, window_params = [{transform_indices = @transform_0, window_bounds = array<i64: 1, 40, 10>}, {pipeline_mode = #tpu.pipeline_mode<synchronous>, transform_indices = @transform_1, window_bounds = array<i64: 5, 10, 36>}, {pipeline_mode = #tpu.pipeline_mode<synchronous>, transform_indices = @transform_2, window_bounds = array<i64: 1, 36>}, {pipeline_mode = #tpu.pipeline_mode<synchronous>, transform_indices = @transform_3, window_bounds = array<i64: 16, 36>}, {pipeline_mode = #tpu.pipeline_mode<synchronous>, transform_indices = @transform_4, window_bounds = array<i64: 36, 3>}, {pipeline_mode = #tpu.pipeline_mode<synchronous>, transform_indices = @transform_5, window_bounds = array<i64: 1, 3>}, {transform_indices = @transform_6, window_bounds = array<i64: 2, 3>}]} {
    %c0 = arith.constant 0 : index
    %c0_0 = arith.constant 0 : index
    %c0_1 = arith.constant 0 : index
    %0 = vector.load %arg1[%c0, %c0_0, %c0_1] : memref<1x40x10xf32, #tpu.memory_space<vmem>>, vector<1x32x10xf32>
    %1 = vector.shape_cast %0 : vector<1x32x10xf32> to vector<32x10xf32>
    %c0_2 = arith.constant 0 : index
    %c0_3 = arith.constant 0 : index
    %c0_4 = arith.constant 0 : index
    %2 = vector.load %arg2[%c0_2, %c0_3, %c0_4] : memref<5x10x36xf32, #tpu.memory_space<vmem>>, vector<1x10x36xf32>
    %3 = vector.shape_cast %2 : vector<1x10x36xf32> to vector<10x36xf32>
    %cst = arith.constant dense<0.000000e+00> : vector<32x36xf32>
    %4 = tpu.matmul %1, %3, %cst {dimension_numbers = #tpu.dot_dimension_numbers<[1], [0], [0], [1], [0, 0, 1, 1], [], []>} : vector<32x10xf32>, vector<10x36xf32>, vector<32x36xf32> -> vector<32x36xf32>
    %c0_5 = arith.constant 0 : index
    %c1 = arith.constant 1 : index
    %c0_6 = arith.constant 0 : index
    %5 = vector.load %arg1[%c0_5, %c1, %c0_6] : memref<1x40x10xf32, #tpu.memory_space<vmem>>, vector<1x32x10xf32>
    %6 = vector.shape_cast %5 : vector<1x32x10xf32> to vector<32x10xf32>
    %c1_7 = arith.constant 1 : index
    %c0_8 = arith.constant 0 : index
    %c0_9 = arith.constant 0 : index
    %7 = vector.load %arg2[%c1_7, %c0_8, %c0_9] : memref<5x10x36xf32, #tpu.memory_space<vmem>>, vector<1x10x36xf32>
    %8 = vector.shape_cast %7 : vector<1x10x36xf32> to vector<10x36xf32>
    %cst_10 = arith.constant dense<0.000000e+00> : vector<32x36xf32>
    %9 = tpu.matmul %6, %8, %cst_10 {dimension_numbers = #tpu.dot_dimension_numbers<[1], [0], [0], [1], [0, 0, 1, 1], [], []>} : vector<32x10xf32>, vector<10x36xf32>, vector<32x36xf32> -> vector<32x36xf32>
    %10 = arith.addf %4, %9 : vector<32x36xf32>
    %c0_11 = arith.constant 0 : index
    %c2 = arith.constant 2 : index
    %c0_12 = arith.constant 0 : index
    %11 = vector.load %arg1[%c0_11, %c2, %c0_12] : memref<1x40x10xf32, #tpu.memory_space<vmem>>, vector<1x32x10xf32>
    %12 = vector.shape_cast %11 : vector<1x32x10xf32> to vector<32x10xf32>
    %c2_13 = arith.constant 2 : index
    %c0_14 = arith.constant 0 : index
    %c0_15 = arith.constant 0 : index
    %13 = vector.load %arg2[%c2_13, %c0_14, %c0_15] : memref<5x10x36xf32, #tpu.memory_space<vmem>>, vector<1x10x36xf32>
    %14 = vector.shape_cast %13 : vector<1x10x36xf32> to vector<10x36xf32>
    %cst_16 = arith.constant dense<0.000000e+00> : vector<32x36xf32>
    %15 = tpu.matmul %12, %14, %cst_16 {dimension_numbers = #tpu.dot_dimension_numbers<[1], [0], [0], [1], [0, 0, 1, 1], [], []>} : vector<32x10xf32>, vector<10x36xf32>, vector<32x36xf32> -> vector<32x36xf32>
    %16 = arith.addf %10, %15 : vector<32x36xf32>
    %c0_17 = arith.constant 0 : index
    %c3 = arith.constant 3 : index
    %c0_18 = arith.constant 0 : index
    %17 = vector.load %arg1[%c0_17, %c3, %c0_18] : memref<1x40x10xf32, #tpu.memory_space<vmem>>, vector<1x32x10xf32>
    %18 = vector.shape_cast %17 : vector<1x32x10xf32> to vector<32x10xf32>
    %c3_19 = arith.constant 3 : index
    %c0_20 = arith.constant 0 : index
    %c0_21 = arith.constant 0 : index
    %19 = vector.load %arg2[%c3_19, %c0_20, %c0_21] : memref<5x10x36xf32, #tpu.memory_space<vmem>>, vector<1x10x36xf32>
    %20 = vector.shape_cast %19 : vector<1x10x36xf32> to vector<10x36xf32>
    %cst_22 = arith.constant dense<0.000000e+00> : vector<32x36xf32>
    %21 = tpu.matmul %18, %20, %cst_22 {dimension_numbers = #tpu.dot_dimension_numbers<[1], [0], [0], [1], [0, 0, 1, 1], [], []>} : vector<32x10xf32>, vector<10x36xf32>, vector<32x36xf32> -> vector<32x36xf32>
    %22 = arith.addf %16, %21 : vector<32x36xf32>
    %c0_23 = arith.constant 0 : index
    %c4 = arith.constant 4 : index
    %c0_24 = arith.constant 0 : index
    %23 = vector.load %arg1[%c0_23, %c4, %c0_24] : memref<1x40x10xf32, #tpu.memory_space<vmem>>, vector<1x32x10xf32>
    %24 = vector.shape_cast %23 : vector<1x32x10xf32> to vector<32x10xf32>
    %c4_25 = arith.constant 4 : index
    %c0_26 = arith.constant 0 : index
    %c0_27 = arith.constant 0 : index
    %25 = vector.load %arg2[%c4_25, %c0_26, %c0_27] : memref<5x10x36xf32, #tpu.memory_space<vmem>>, vector<1x10x36xf32>
    %26 = vector.shape_cast %25 : vector<1x10x36xf32> to vector<10x36xf32>
    %cst_28 = arith.constant dense<0.000000e+00> : vector<32x36xf32>
    %27 = tpu.matmul %24, %26, %cst_28 {dimension_numbers = #tpu.dot_dimension_numbers<[1], [0], [0], [1], [0, 0, 1, 1], [], []>} : vector<32x10xf32>, vector<10x36xf32>, vector<32x36xf32> -> vector<32x36xf32>
    %28 = arith.addf %22, %27 : vector<32x36xf32>
    %c0_29 = arith.constant 0 : index
    %c0_30 = arith.constant 0 : index
    %29 = vector.load %arg3[%c0_29, %c0_30] : memref<1x36xf32, #tpu.memory_space<vmem>>, vector<1x36xf32>
    %30 = vector.broadcast %29 : vector<1x36xf32> to vector<32x36xf32>
    %31 = arith.addf %28, %30 : vector<32x36xf32>
    %32 = math.tanh %31 : vector<32x36xf32>
    %33 = vector.shape_cast %32 : vector<32x36xf32> to vector<2x16x36xf32>
    %c0_31 = arith.constant 0 : index
    %c0_32 = arith.constant 0 : index
    %34 = vector.load %arg4[%c0_31, %c0_32] : memref<16x36xf32, #tpu.memory_space<vmem>>, vector<16x36xf32>
    %35 = vector.shape_cast %34 : vector<16x36xf32> to vector<1x16x36xf32>
    %36 = vector.broadcast %35 : vector<1x16x36xf32> to vector<2x16x36xf32>
    %37 = arith.addf %33, %36 : vector<2x16x36xf32>
    %cst_33 = arith.constant dense<0xFF800000> : vector<2x36xf32>
    %38 = vector.multi_reduction <maximumf>, %37, %cst_33 [1] : vector<2x16x36xf32> to vector<2x36xf32>
    %c0_34 = arith.constant 0 : index
    %c0_35 = arith.constant 0 : index
    %39 = vector.load %arg5[%c0_34, %c0_35] : memref<36x3xf32, #tpu.memory_space<vmem>>, vector<36x3xf32>
    %cst_36 = arith.constant dense<0.000000e+00> : vector<2x3xf32>
    %40 = tpu.matmul %38, %39, %cst_36 {dimension_numbers = #tpu.dot_dimension_numbers<[1], [0], [0], [1], [0, 0, 1, 1], [], []>} : vector<2x36xf32>, vector<36x3xf32>, vector<2x3xf32> -> vector<2x3xf32>
    %c0_37 = arith.constant 0 : index
    %c0_38 = arith.constant 0 : index
    %41 = vector.load %arg6[%c0_37, %c0_38] : memref<1x3xf32, #tpu.memory_space<vmem>>, vector<1x3xf32>
    %42 = vector.broadcast %41 : vector<1x3xf32> to vector<2x3xf32>
    %43 = arith.addf %40, %42 : vector<2x3xf32>
    %cst_39 = arith.constant dense<0xFF800000> : vector<2xf32>
    %44 = vector.multi_reduction <maximumf>, %43, %cst_39 [1] : vector<2x3xf32> to vector<2xf32>
    %45 = vector.shape_cast %44 : vector<2xf32> to vector<2x1xf32>
    %46 = vector.broadcast %45 : vector<2x1xf32> to vector<2x3xf32>
    %47 = arith.subf %43, %46 : vector<2x3xf32>
    %48 = math.exp %47 : vector<2x3xf32>
    %cst_40 = arith.constant dense<0.000000e+00> : vector<2xf32>
    %49 = vector.multi_reduction <add>, %48, %cst_40 [1] : vector<2x3xf32> to vector<2xf32>
    %50 = vector.shape_cast %49 : vector<2xf32> to vector<2x1xf32>
    %51 = vector.broadcast %50 : vector<2x1xf32> to vector<2x3xf32>
    %52 = arith.divf %48, %51 : vector<2x3xf32>
    %c0_41 = arith.constant 0 : index
    %c0_42 = arith.constant 0 : index
    %53 = vector.load %arg7[%c0_41, %c0_42] : memref<2x3xf32, #tpu.memory_space<vmem>>, vector<2x3xf32>
    tpu.vector_store %arg7[%c0_41, %c0_42], %52 {strides = array<i32>} : memref<2x3xf32, #tpu.memory_space<vmem>>, vector<2x3xf32>,
    return
  }
  func.func @transform_0(%arg0: i32) -> (i32, i32, i32) {
    %c0_i32 = arith.constant 0 : i32
    %c0_i32_0 = arith.constant 0 : i32
    %c0_i32_1 = arith.constant 0 : i32
    return %arg0, %c0_i32, %c0_i32_0 : i32, i32, i32
  }
  func.func @transform_1(%arg0: i32) -> (i32, i32, i32) {
    %c0_i32 = arith.constant 0 : i32
    %c0_i32_0 = arith.constant 0 : i32
    %c0_i32_1 = arith.constant 0 : i32
    %c0_i32_2 = arith.constant 0 : i32
    return %c0_i32, %c0_i32_0, %c0_i32_1 : i32, i32, i32
  }
  func.func @transform_2(%arg0: i32) -> (i32, i32) {
    %c0_i32 = arith.constant 0 : i32
    %c0_i32_0 = arith.constant 0 : i32
    %c0_i32_1 = arith.constant 0 : i32
    return %c0_i32, %c0_i32_0 : i32, i32
  }
  func.func @transform_3(%arg0: i32) -> (i32, i32) {
    %c0_i32 = arith.constant 0 : i32
    %c0_i32_0 = arith.constant 0 : i32
    %c0_i32_1 = arith.constant 0 : i32
    return %c0_i32, %c0_i32_0 : i32, i32
  }
  func.func @transform_4(%arg0: i32) -> (i32, i32) {
    %c0_i32 = arith.constant 0 : i32
    %c0_i32_0 = arith.constant 0 : i32
    %c0_i32_1 = arith.constant 0 : i32
    return %c0_i32, %c0_i32_0 : i32, i32
  }
  func.func @transform_5(%arg0: i32) -> (i32, i32) {
    %c0_i32 = arith.constant 0 : i32
    %c0_i32_0 = arith.constant 0 : i32
    %c0_i32_1 = arith.constant 0 : i32
    return %c0_i32, %c0_i32_0 : i32, i32
  }
  func.func @transform_6(%arg0: i32) -> (i32, i32) {
    %c0_i32 = arith.constant 0 : i32
    %c0_i32_0 = arith.constant 0 : i32
    return %arg0, %c0_i32 : i32, i32
  }
}

</mosaic_0001>

<bundles_post_ra>
// kernel: tpu_custom_call.1
= control target key start
LH: loop header
LB: loop body
LE: loop exit
PB: predicated region body
PF: predicated region fallthrough
CT: control target
= control target key end

     0   :  { %11 = vsyncpa [#allocation3], 0  ;;  %s727_s0 = inlined_call_operand.vmem [shape: f32[1,40,10], index: 0, kind: input, shape index: {}]   ;;  %s728_s1 = inlined_call_operand.vmem [shape: f32[5,10,36], index: 1, kind: input, shape index: {}]   ;;  %s729_s2 = inlined_call_operand.vmem [shape: f32[1,36], index: 2, kind: input, shape index: {}]   ;;  %s730_s3 = inlined_call_operand.hbm [shape: f32[16,36], index: 3, kind: input, shape index: {}]   ;;  %s731_s4 = inlined_call_operand.vmem [shape: f32[36,3], index: 4, kind: input, shape index: {}]   ;;  %s732_s5 = inlined_call_operand.vmem [shape: f32[1,3], index: 5, kind: input, shape index: {}]   ;;  %s733_s6 = inlined_call_operand.hbm [shape: f32[2,3], index: 6, kind: output, shape index: {}]  }
   0x1   :  { %12 = vsyncpa [#allocation4], 0  ;;  %s23_s23 = sshll.u32 %s730_s3, 4  ;;  %s536_s24 = smov [#allocation2]   ;;  %s24_s23 = int_to_ptr.hbm [resolvable:$true] %s23_s23 }
   0x2   :  { %s25_s25 = sshll.u32 %s536_s24, 4  ;;  %s537_s26 = smov 128   ;;  %s26_s25 = int_to_ptr.vmem [resolvable:$true] %s25_s25 }
   0x3   :  { %s538_s27 = smov 8  }
   0x4   :  { %31 = dma.hbm_to_vmem [thread:$0]  %s24_s23, 256, %s26_s25, [#allocation3], %s537_s26, %s537_s26, %s538_s27  }
   0x5   :  { %532 = dma.done.wait [#allocation3], 256  }
   0x6   :  { %533 = vsyncadd [#allocation3], 4294967040  ;;  %vm66_vm0 = vcmask 1041408   ;;  %v428_v0 = vld [vmem:[%s728_s1 + $0x18] sm:$0x3]  ;;  %v427_v2 = vld [vmem:[%s728_s1 + $0x10] sm:$0xff] }
   0x7   :  { %v45_v1 = vld [vmem:[%s728_s1 + $0x8] sm:$0x3]  ;;  %462 = vmatpush.msk.msra.mxu2 %vm66_vm0, %v428_v0  ;;  %v44_v3 = vld [vmem:[%s728_s1] sm:$0xff]  ;;  %vm53_vm1 = vcmask 80896   ;;  %463 = vmatpush.msk.msra.mxu3 %vm66_vm0, %v428_v0  ;;  %v447_v9 = vld [vmem:[%s728_s1 + $0x38] sm:$0x3] }
   0x8   :  { %434 = vmatpush.msk.msra.mxu1 %vm66_vm0, %v45_v1  ;;  %v47_v4 = vld [vmem:[%s727_s0 + $0x9] sm:$0xff]  ;;  %v40_v5 = vld [vmem:[%s727_s0] sm:$0xff]  ;;  %429 = vmatpush.msk.msra.mxu0 %vm66_vm0, %v428_v0  ;;  %v48_v13 = vld [vmem:[%s727_s0 + $0x11] sm:$0xff]  ;;  %vm360_vm2 = vcmask 1043456   ;;  %vm326_vm3 = vcmask 293888   ;;  %vm356_vm4 = vcmask 1041409  }
   0x9   :  { %v440_v6 = vld [vmem:[%s728_s1 + $0x28] sm:$0x3]  ;;  %464 = vmatpush.msra.mxu2 %v427_v2  ;;  %v49_v7 = vld [vmem:[%s727_s0 + $0x19] sm:$0xff]  ;;  %465 = vmatpush.msra.mxu3 %v427_v2  ;;  %v446_v11 = vld [vmem:[%s728_s1 + $0x30] sm:$0xff]  ;;  %vm384_vm5 = vcmask 17408   ;;  %s417_s25 = sshll.u32 %s733_s6, 4  ;;  %s418_s25 = int_to_ptr.hbm [resolvable:$true] %s417_s25 }
   0xa   :  { %129 = vmatpush.msra.mxu1 %v44_v3  ;;  %431 = vmatmul.msk.f32.vlgmr.msra.gmra.mxu2 %vm53_vm1, %v47_v4  ;;  %v439_v8 = vld [vmem:[%s728_s1 + $0x20] sm:$0xff]  ;;  %v454_v12 = vld [vmem:[%s728_s1 + $0x48] sm:$0x3]  ;;  %v42_v18 = vld [vmem:[%s727_s0 + $0x10] sm:$0xff] }
   0xb   :  { %435 = vmatmul.msk.f32.vlgmr.msra.gmra.mxu1 %vm53_vm1, %v40_v5  ;;  %441 = vmatpush.msk.msrb.mxu2 %vm66_vm0, %v440_v6  ;;  %v46_v10 = vld [vmem:[%s727_s0 + $0x1] sm:$0xff]  ;;  %v199_v20 = vld [vmem:[%s727_s0 + $0xb] sm:$0xff]  ;;  %v43_v22 = vld [vmem:[%s727_s0 + $0x18] sm:$0xff] }
   0xc   :  { %433 = vmatmul.msk.f32.vlgmr.msra.gmra.mxu3 %vm53_vm1, %v49_v7  ;;  %85 = vmatpush.msra.mxu0 %v427_v2  ;;  %v453_v14 = vld [vmem:[%s728_s1 + $0x40] sm:$0xff]  ;;  %v41_v15 = vld [vmem:[%s727_s0 + $0x8] sm:$0xff]  ;;  %v200_v24 = vld [vmem:[%s727_s0 + $0x13] sm:$0xff] }
   0xd   :  { %180 = vmatpush.msrb.mxu2 %v439_v8  ;;  %448 = vmatpush.msk.msrb.mxu3 %vm66_vm0, %v447_v9  ;;  %v198_v16 = vld [vmem:[%s727_s0 + $0x3] sm:$0xff]  ;;  %v254_v21 = vld [vmem:[%s727_s0 + $0xc] sm:$0xff]  ;;  %v255_v25 = vld [vmem:[%s727_s0 + $0x14] sm:$0xff] }
   0xe   :  { %430 = vmatmul.msk.f32.vlgmr.msra.gmra.mxu0 %vm53_vm1, %v46_v10  ;;  %v253_v17 = vld [vmem:[%s727_s0 + $0x4] sm:$0xff]  ;;  %v145_v26 = vld [vmem:[%s727_s0 + $0x12] sm:$0xff]  ;;  %v201_v27 = vld [vmem:[%s727_s0 + $0x1b] sm:$0xff] }
   0xf   :  { %235 = vmatpush.msrb.mxu3 %v446_v11  ;;  %455 = vmatpush.msk.msrb.mxu0 %vm66_vm0, %v454_v12  ;;  %v143_v19 = vld [vmem:[%s727_s0 + $0x2] sm:$0xff]  ;;  %v144_v23 = vld [vmem:[%s727_s0 + $0xa] sm:$0xff]  ;;  %v146_v29 = vld [vmem:[%s727_s0 + $0x1a] sm:$0xff] }
  0x10   :  { %v256_v28 = vld [vmem:[%s727_s0 + $0x1c] sm:$0xff]  ;;  %v347_v50 = vld [vmem:[%s731_s4 + $0x10] sm:$0xff]  ;;  %v346_v53 = vld [vmem:[%s731_s4 + $0x8] sm:$0xff] }
  0x11   :  { %290 = vmatpush.msrb.mxu0 %v453_v14  ;;  %v349_v40 = vld [vmem:[%s731_s4 + $0x20] sm:$0xf]  ;;  %v348_v49 = vld [vmem:[%s731_s4 + $0x18] sm:$0xff]  ;;  %v321_v2 = vld [vmem:[#allocation2 + $0x8] sm:$0xff] }
  0x12   :  { %432 = vmatmul.msk.f32.gmra.mxu2 %vm53_vm1, %v48_v13  ;;  %460 = vmatpush.msk.msrb.mxu1 %vm360_vm2, %v349_v40  ;;  %v470_v47 = vld [vmem:[%s729_s2] ss:$0 sm:$0xff] }
  0x13   :  { %436 = vmatmul.msk.f32.gmra.mxu1 %vm53_vm1, %v41_v15  ;;  %v345_v56 = vld [vmem:[%s731_s4] sm:$0xff] }
  0x14   :  { %449 = vmatmul.msk.f32.vlgmr.msrb.gmra.mxu3 %vm53_vm1, %v198_v16  ;;  %376 = vmatpush.msrb.mxu1 %v348_v49  ;;  %v320_v7 = vld [vmem:[#allocation2] sm:$0xff] }
  0x16   :  { %456 = vmatmul.msk.f32.vlgmr.msrb.gmra.mxu0 %vm53_vm1, %v253_v17  ;;  %377 = vmatpush.msrb.mxu1 %v347_v50 }
  0x18   :  { %378 = vmatpush.msrb.mxu1 %v346_v53 }
  0x1a   :  { %442 = vmatmul.msk.f32.vlgmr.msrb.gmra.mxu2 %vm53_vm1, %v143_v19  ;;  %379 = vmatpush.msrb.mxu1 %v345_v56 }
  0x1b   :  { %437 = vmatmul.msk.f32.gmra.mxu1 %vm53_vm1, %v42_v18 }
  0x1c   :  { %450 = vmatmul.msk.f32.gmra.mxu3 %vm53_vm1, %v199_v20 }
  0x1e   :  { %457 = vmatmul.msk.f32.gmra.mxu0 %vm53_vm1, %v254_v21 }
  0x22   :  { %443 = vmatmul.msk.f32.gmra.mxu2 %vm53_vm1, %v144_v23 }
  0x23   :  { %438 = vmatmul.msk.f32.gmra.mxu1 %vm53_vm1, %v43_v22 }
  0x24   :  { %451 = vmatmul.msk.f32.gmra.mxu3 %vm53_vm1, %v200_v24 }
  0x26   :  { %458 = vmatmul.msk.f32.gmra.mxu0 %vm53_vm1, %v255_v25 }
  0x2a   :  { %444 = vmatmul.msk.f32.gmra.mxu2 %vm53_vm1, %v145_v26 }
  0x2c   :  { %452 = vmatmul.msk.f32.gmra.mxu3 %vm53_vm1, %v201_v27 }
  0x2e   :  { %459 = vmatmul.msk.f32.gmra.mxu0 %vm53_vm1, %v256_v28 }
  0x32   :  { %445 = vmatmul.msk.f32.gmra.mxu2 %vm53_vm1, %v146_v29 }
  0x88   :  { %v131_v33 = vpop.f32.mrf.mxu1 }
  0x8b   :  { %v87_v32 = vpop.f32.mrf.mxu0 }
  0x8c   :  { %v132_v37 = vadd.f32 %v131_v33, %v87_v32 }
  0x8d   :  { %v90_v30 = vpop.f32.mrf.mxu2 }
  0x8f   :  { %v96_v31 = vpop.f32.mrf.mxu3 }
  0x90   :  { %v134_v38 = vpop.f32.mrf.mxu1 }
  0x91   :  { %v135_v45 = vadd.f32 %v134_v38, %v90_v30 }
  0x93   :  { %v292_v36 = vpop.f32.mrf.mxu0 }
  0x95   :  { %v93_v34 = vpop.f32.mrf.mxu2 }
  0x97   :  { %v237_v35 = vpop.f32.mrf.mxu3 }
  0x98   :  { %v137_v52 = vpop.f32.mrf.mxu1 }
  0x99   :  { %v138_v59 = vadd.f32 %v137_v52, %v93_v34 }
  0x9b   :  { %v295_v44 = vpop.f32.mrf.mxu0 }
  0x9d   :  { %v182_v39 = vpop.f32.mrf.mxu2 }
  0x9e   :  { %v194_v41 = vadd.f32 %v182_v39, %v132_v37 }
  0x9f   :  { %v240_v43 = vpop.f32.mrf.mxu3 }
  0xa0   :  { %v249_v42 = vadd.f32 %v237_v35, %v194_v41  ;;  %v140_v1 = vpop.f32.mrf.mxu1  ;;  %v471_v41 = vld [vmem:[%s732_s5] ss:$0 sm:$0xff]  ;;  %s539_s5 = smov [#allocation5]  }
  0xa1   :  { %v141_v6 = vadd.f32 %v140_v1, %v96_v31  ;;  %s415_s22 = sshll.u32 %s539_s5, 4  ;;  %s416_s22 = int_to_ptr.vmem [resolvable:$true] %s415_s22 }
  0xa2   :  { %v304_v46 = vadd.f32 %v292_v36, %v249_v42 }
  0xa3   :  { %v298_v62 = vpop.f32.mrf.mxu0 }
  0xa4   :  { %v312_v55 = vadd.f32 %v470_v47, %v304_v46 }
  0xa5   :  { %v185_v48 = vpop.f32.mrf.mxu2 }
  0xa6   :  { %v195_v51 = vadd.f32 %v185_v48, %v135_v45  ;;  %472 = vtanh.f32 %v312_v55 }
  0xa7   :  { %v243_v58 = vpop.f32.mrf.mxu3 }
  0xa8   :  { %v250_v54 = vadd.f32 %v240_v43, %v195_v51 }
  0xaa   :  { %v305_v57 = vadd.f32 %v295_v44, %v250_v54 }
  0xab   :  { %v301_v14 = vpop.f32.mrf.mxu0 }
  0xac   :  { %v313_v60 = vadd.f32 %v470_v47, %v305_v57  ;;  %v473_v4 = vpop.eup %472 }
  0xad   :  { %v188_v61 = vpop.f32.mrf.mxu2  ;;  %v322_v13 = vadd.f32 %v473_v4, %v320_v7 }
  0xae   :  { %474 = vtanh.f32 %v313_v60  ;;  %v196_v63 = vadd.f32 %v188_v61, %v138_v59 }
  0xaf   :  { %v246_v10 = vpop.f32.mrf.mxu3  ;;  %v327_v18 = vsel %vm326_vm3, %v322_v13, -inf }
  0xb0   :  { %v251_v0 = vadd.f32 %v243_v58, %v196_v63 }
  0xb2   :  { %v306_v3 = vadd.f32 %v298_v62, %v251_v0 }
  0xb4   :  { %v475_v5 = vpop.eup %474  ;;  %v314_v11 = vadd.f32 %v470_v47, %v306_v3 }
  0xb5   :  { %v323_v8 = vadd.f32 %v475_v5, %v321_v2  ;;  %v191_v9 = vpop.f32.mrf.mxu2 }
  0xb6   :  { %v197_v12 = vadd.f32 %v191_v9, %v141_v6  ;;  %476 = vtanh.f32 %v314_v11 }
  0xb7   :  { %v328_v16 = vsel %vm326_vm3, %v323_v8, -inf }
  0xb8   :  { %v252_v15 = vadd.f32 %v246_v10, %v197_v12  ;;  %v329_v20 = vmax.f32 %v327_v18, %v328_v16 }
  0xba   :  { %v307_v17 = vadd.f32 %v301_v14, %v252_v15  ;;  %v330_v22 = vrot.slane %v329_v20, 4 }
  0xbc   :  { %v315_v19 = vadd.f32 %v470_v47, %v307_v17  ;;  %v477_v21 = vpop.eup %476  ;;  %v331_v25 = vmax.f32 %v329_v20, %v330_v22 }
  0xbd   :  { %v324_v23 = vadd.f32 %v477_v21, %v320_v7 }
  0xbe   :  { %478 = vtanh.f32 %v315_v19  ;;  %v332_v29 = vrot.slane %v331_v25, 2 }
  0xbf   :  { %v336_v27 = vsel %vm326_vm3, %v324_v23, -inf }
  0xc0   :  { %v333_v32 = vmax.f32 %v331_v25, %v332_v29 }
  0xc2   :  { %v334_v35 = vrot.slane %v333_v32, 1 }
  0xc4   :  { %v479_v24 = vpop.eup %478  ;;  %v335_v38 = vmax.f32 %v333_v32, %v334_v35 }
  0xc5   :  { %v325_v26 = vadd.f32 %v479_v24, %v321_v2 }
  0xc7   :  { %v337_v28 = vsel %vm326_vm3, %v325_v26, -inf }
  0xc8   :  { %v338_v30 = vmax.f32 %v336_v27, %v337_v28 }
  0xca   :  { %v339_v31 = vrot.slane %v338_v30, 4 }
  0xcc   :  { %v340_v33 = vmax.f32 %v338_v30, %v339_v31 }
  0xce   :  { %v341_v34 = vrot.slane %v340_v33, 2 }
  0xd0   :  { %v342_v36 = vmax.f32 %v340_v33, %v341_v34 }
  0xd2   :  { %v343_v37 = vrot.slane %v342_v36, 1 }
  0xd4   :  { %v344_v39 = vmax.f32 %v342_v36, %v343_v37 }
  0xd6   :  { %v357_v40 = vsel %vm356_vm4, %v344_v39, %v335_v38 }
  0xd7   :  { %461 = vmatmul.msk.f32.vlgmr.msrb.gmra.mxu1 %vm326_vm3, %v357_v40 }
 0x154   :  { %v381_v42 = vpop.f32.mrf.mxu1 }
 0x155   :  { %v382_v43 = vadd.f32 %v471_v41, %v381_v42 }
 0x157   :  { %v385_v44 = vsel %vm384_vm5, %v382_v43, -inf }
 0x158   :  { %386 = vmax.xlane.f32.xlu0 %v385_v44 }
 0x1cb   :  { %v387_v45 = vpop.xlane.xlu0 %386 }
 0x1cc   :  { %v388_v46 = vsub.f32 %v382_v43, %v387_v45 }
 0x1ce   :  { %v389_v47 = vmul.f32 1.442695, %v388_v46 }
 0x1d0   :  { %480 = vpow2.f32 %v389_v47 }
 0x1d6   :  { %v481_v48 = vpop.eup %480 }
 0x1d7   :  { %v391_v49 = vsel %vm384_vm5, %v481_v48, 0.0 }
 0x1d8   :  { %392 = vadd.xlane.f32.xlu0 %v391_v49 }
 0x24b   :  { %v393_v50 = vpop.xlane.xlu0 %392 }
 0x24c   :  { %482 = vrcp.f32 %v393_v50  ;;  %v405_v54 = vand.u32 2147483648, %v393_v50  ;;  %v403_v56 = vand.u32 2147483647, %v393_v50  ;;  %vm399_vm7 = vweird.f32 %v393_v50 }
 0x24e   :  { %v406_v58 = vor.u32 1.1754944e-38, %v405_v54  ;;  %vm404_vm9 = vcmp.eq.f32.partialorder %v403_v56, 8.507059e+37 }
 0x252   :  { %v483_v51 = vpop.eup %482 }
 0x253   :  { %v395_v52 = vmul.f32 %v483_v51, %v393_v50  ;;  %vm400_vm6 = vweird.f32 %v483_v51 }
 0x254   :  { %vm401_vm8 = vmor %vm399_vm7, %vm400_vm6 }
 0x255   :  { %v396_v53 = vsub.f32 1.0, %v395_v52 }
 0x257   :  { %v397_v55 = vmul.f32 %v483_v51, %v396_v53 }
 0x259   :  { %v398_v57 = vadd.f32 %v483_v51, %v397_v55 }
 0x25b   :  { %v402_v59 = vsel %vm401_vm8, %v483_v51, %v398_v57 }
 0x25c   :  { %v407_v60 = vsel %vm404_vm9, %v406_v58, %v402_v59 }
 0x25d   :  { %v408_v61 = vmul.f32 %v481_v48, %v407_v60 }
 0x25f   :  { %409 = vst.msk [vmem:[#allocation5] sm:$0x3] %vm384_vm5, %v408_v61 }
 0x260   :  { %420 = dma.vmem_to_hbm [thread:$0]  %s416_s22, 32, %s418_s25, [#allocation4]  }
 0x261   :  { %534 = dma.done.wait [#allocation4], 32  }
 0x262   :  { %535 = vsyncadd [#allocation4], 4294967264 }
 0x263   :  { %425 = vsyncpa [#allocation3], 1 }
 0x264   :  { %426 = vsyncpa [#allocation4], 1 }

</bundles_post_ra>
